<compile_context>
chip_gen: v7x
topology: tpu7x:2x2x1
jax: 0.10.0
libtpu: 0.0.40
codegen_flags: <defaults>
</compile_context>

<pallas_src>
import numpy as np
import jax
import jax.numpy as jnp
from jax.experimental import pallas as pl
from jax.experimental.pallas import tpu as pltpu

_C_ALIGN = 128            # lane width
_SLAB_ALIGN = 8 * 128     # pad total element count to a multiple of one vreg


def _make_kernel(inv_len: float, p: float):
    """Kernel factory: constants are baked in at trace time."""
    inv_len = float(inv_len)
    p = float(p)

    def kernel(x_ref, out_ref):
        # custom_STE.apply(t, False) forward == hard binarize at 0.5.
        bx = (x_ref[...] > 0.5).astype(jnp.float32)         # (rows, 128)
        lane = jnp.sum(bx, axis=1, keepdims=True)            # (rows, 1)
        total = jnp.sum(lane, axis=0, keepdims=True)          # (1, 1)
        # mean over the *true* concatenated length, then |mean - p|
        out_ref[...] = jnp.abs(total * inv_len - p)

    return kernel


class ResourceConstraintPallas:
    """Pallas/TPU equivalent of utils.net_utils.resource_constraint."""

    def __init__(self, num_epoch, cut_off_epoch, p):
        self.num_epoch = num_epoch          # unused by forward (parity only)
        self.cut_off_epoch = cut_off_epoch  # unused by forward (parity only)
        self.p = float(p)
        self._compiled = {}                 # lengths-signature -> jitted callable

    def _build(self, lengths):
        total = int(sum(lengths))
        slab = max(_SLAB_ALIGN,
                   ((total + _SLAB_ALIGN - 1) // _SLAB_ALIGN) * _SLAB_ALIGN)
        rows = slab // _C_ALIGN             # multiple of 8 sublanes, lane-dense

        kernel = _make_kernel(1.0 / float(total), self.p)

        call = pl.pallas_call(
            kernel,
            out_shape=jax.ShapeDtypeStruct((1, 1), jnp.float32),
            in_specs=[pl.BlockSpec(memory_space=pltpu.MemorySpace.VMEM)],
            out_specs=pl.BlockSpec(memory_space=pltpu.MemorySpace.VMEM),
        )

        @jax.jit
        def run(*gates):
            # Flat pack: one concat, one pad, one reshape (O(1) HLOs in L).
            flat = jnp.concatenate(
                [jnp.asarray(g, jnp.float32).reshape(-1) for g in gates])
            x = jnp.pad(flat, (0, slab - total)).reshape(rows, _C_ALIGN)
            out = call(x)
            return out[0, 0]

        return run

    def __call__(self, gates, epoch=0):
        # `epoch` is accepted (and ignored) exactly like the PyTorch forward.
        lengths = tuple(int(g.shape[0]) for g in gates)
        fn = self._compiled.get(lengths)
        if fn is None:
            fn = self._build(lengths)
            self._compiled[lengths] = fn
        return fn(*gates)


def _reference(gates, p):
    """Pure-numpy mirror of the PyTorch forward (eval-mode STE)."""
    cat = np.concatenate([(np.asarray(g) > 0.5).astype(np.float32)
                          for g in gates])
    return abs(float(cat.mean()) - p)


if __name__ == "__main__":
    # Small synthetic network: 4 layers of per-channel gates.
    channel_sizes = [16, 16, 32, 32]
    p = 0.5
    num_epoch, cut_off_epoch = 100, 80

    mod = ResourceConstraintPallas(num_epoch, cut_off_epoch, p)

    # Deterministic per-layer channel gates in [0, 1).
    key = jax.random.PRNGKey(0)
    keys = jax.random.split(key, len(channel_sizes))
    gates = [jax.random.uniform(keys[i], (channel_sizes[i],), dtype=jnp.float32)
             for i in range(len(channel_sizes))]

    result = mod(gates, epoch=10)
    result = jax.block_until_ready(result)

    ref = _reference(gates, p)
    assert abs(float(result) - ref) < 1e-5 * max(1.0, abs(ref)), \
        (float(result), ref)
    print("KERNEL_OK")
</pallas_src>

<mosaic_0001>
module attributes {stable_mosaic.version = 11 : i64} {
  func.func @kernel(%arg0: memref<8x128xf32, #tpu.memory_space<vmem>>, %arg1: memref<1x1xf32, #tpu.memory_space<vmem>>) attributes {dimension_semantics = [], scalar_prefetch = 0 : i64, scratch_operands = 0 : i64, tpu.core_type = #tpu.core_type<tc>} {
    %c0 = arith.constant 0 : index
    %c0_0 = arith.constant 0 : index
    %0 = vector.load %arg0[%c0, %c0_0] : memref<8x128xf32, #tpu.memory_space<vmem>>, vector<8x128xf32>
    %cst = arith.constant 5.000000e-01 : f32
    %1 = vector.broadcast %cst : f32 to vector<8x128xf32>
    %2 = arith.cmpf ogt, %0, %1 : vector<8x128xf32>
    %3 = arith.extui %2 : vector<8x128xi1> to vector<8x128xi32>
    %4 = arith.sitofp %3 : vector<8x128xi32> to vector<8x128xf32>
    %cst_1 = arith.constant dense<0.000000e+00> : vector<8xf32>
    %5 = vector.multi_reduction <add>, %4, %cst_1 [1] : vector<8x128xf32> to vector<8xf32>
    %6 = vector.shape_cast %5 : vector<8xf32> to vector<8x1xf32>
    %cst_2 = arith.constant dense<0.000000e+00> : vector<1xf32>
    %7 = vector.multi_reduction <add>, %6, %cst_2 [0] : vector<8x1xf32> to vector<1xf32>
    %8 = vector.shape_cast %7 : vector<1xf32> to vector<1x1xf32>
    %cst_3 = arith.constant 0.010416667 : f32
    %9 = vector.broadcast %cst_3 : f32 to vector<1x1xf32>
    %10 = arith.mulf %8, %9 : vector<1x1xf32>
    %cst_4 = arith.constant 5.000000e-01 : f32
    %11 = vector.broadcast %cst_4 : f32 to vector<1x1xf32>
    %12 = arith.subf %10, %11 : vector<1x1xf32>
    %13 = math.absf %12 : vector<1x1xf32>
    %c0_5 = arith.constant 0 : index
    %c0_6 = arith.constant 0 : index
    %14 = vector.load %arg1[%c0_5, %c0_6] : memref<1x1xf32, #tpu.memory_space<vmem>>, vector<1x1xf32>
    tpu.vector_store %arg1[%c0_5, %c0_6], %13 {strides = array<i32>} : memref<1x1xf32, #tpu.memory_space<vmem>>, vector<1x1xf32>,
    return
  }
}

</mosaic_0001>

<bundles_post_ra>
// kernel: run.1
= control target key start
LH: loop header
LB: loop body
LE: loop exit
PB: predicated region body
PF: predicated region fallthrough
CT: control target
= control target key end

     0   :  { %s95_s0 = inlined_call_operand.vmem [shape: f32[8,128], index: 0, kind: input, shape index: {}]   ;;  %s96_s1 = inlined_call_operand.hbm [shape: f32[1,1], index: 1, kind: output, shape index: {}]  }
   0x1   :  { %v9_v0 = vld [vmem:[%s95_s0] sm:$0xff] }
   0x2   :  { %6 = vsyncpa [#allocation3], 0  ;;  %vm10_vm0 = vcmp.gt.f32.partialorder %v9_v0, 0.5  ;;  %v68_v1 = vmov 0.0   ;;  %s69_s8 = smov [#allocation2]   ;;  %vm24_vm1 = vcmask 0  }
   0x3   :  { %v40_v2 = vsel %vm10_vm0, 1.0, %v68_v1  ;;  %s32_s9 = sshll.u32 %s69_s8, 4  ;;  %s33_s9 = int_to_ptr.vmem [resolvable:$true] %s32_s9 }
   0x4   :  { %13 = vadd.xlane.f32.xlu0 %v40_v2  ;;  %s44_s0 = scalar_lea.vmem %s33_s9, 16  ;;  %s48_s10 = scalar_lea.vmem %s33_s9, 32 }
   0x5   :  { %p45_p0 = scmp.ne.s32.totalorder %s33_s9, %s44_s0  ;;  %p49_p1 = scmp.lt.s32.totalorder %s33_s9, %s33_s9 }
   0x6   :  { %p50_p2 = scmp.lt.s32.totalorder %s48_s10, %s44_s0 }
   0x8   :  { %p51_p3 = por %p50_p2, %p49_p1 }
   0xa   :  { %p52_p4 = pnand %p51_p3, %p45_p0 }
  0x91   :  { %v14_v3 = vpop.xlane.xlu0 %13 }
  0x92   :  { %v15_v4 = vrot.slane %v14_v3, 4 }
  0x94   :  { %v16_v5 = vadd.f32 %v15_v4, %v14_v3 }
  0x96   :  { %v17_v6 = vrot.slane %v16_v5, 2 }
  0x98   :  { %v18_v7 = vadd.f32 %v17_v6, %v16_v5 }
  0x9a   :  { %v19_v8 = vrot.slane %v18_v7, 1 }
  0x9c   :  { %v20_v9 = vadd.f32 %v19_v8, %v18_v7 }
  0x9e   :  { %v21_v10 = vmul.f32 0.010416667, %v20_v9 }
  0xa0   :  { %v41_v11 = vadd.f32 -0.5, %v21_v10 }
  0xa2   :  { %v23_v12 = vand.u32 2147483647, %v41_v11 }
  0xa4   :  { %25 = vst.msk [vmem:[#allocation2] sm:$0x1] %vm24_vm1, %v23_v12 }
  0xa5   :  { %55 = shalt.err (!%p52_p4)
}
  0xa6   :  { %s56_s13 = scalar_lea.hbm %s96_s1, 16 }
  0xa7   :  { %p57_p5 = scmp.ne.s32.totalorder %s96_s1, %s56_s13  ;;  %p60_p6 = scmp.lt.u32.totalorder %s56_s13, %s96_s1 }
  0xa9   :  { %p62_p7 = pnand %p60_p6, %p57_p5 }
  0xab   :  { %65 = shalt.err (!%p62_p7)
}
  0xac   :  { %35 = dma.vmem_to_hbm [thread:$0]  %s33_s9, 16, %s96_s1, [#allocation3]  }
  0xad   :  { %66 = dma.done.wait [#allocation3], 16  }
  0xae   :  { %67 = vsyncadd [#allocation3], 4294967280 }
  0xaf   :  { %39 = vsyncpa [#allocation3], 1 }

</bundles_post_ra>
